<compile_context>
chip_gen: v7x
topology: tpu7x:2x2x1
jax: 0.10.0
libtpu: 0.0.40
codegen_flags: <defaults>
</compile_context>

<pallas_src>
import jax
import jax.numpy as jnp
from jax.experimental import pallas as pl
from jax.experimental.pallas import tpu as pltpu


def _channel_attention_kernel(x_ref, w1_ref, w2_ref, o_ref):
    x = x_ref[...]                                                    # (TM, W)  W = pack*C (lane-dense)
    h = jnp.dot(x, w1_ref[...], preferred_element_type=jnp.float32)  # (TM, pack*H)
    h = jnp.maximum(h, 0.0)                                           # ReLU
    g = jnp.dot(h, w2_ref[...], preferred_element_type=jnp.float32)  # (TM, W)
    gate = jax.nn.sigmoid(g)
    o_ref[...] = (x * gate).astype(o_ref.dtype)                       # elementwise modulation


def _pick_tm(rows, width, itemsize):
    """Row-tile size, chosen by bytes (not rows).

    Target ~2 MiB per input tile (past the measured HBM-roofline knee); the
    double-buffered 2x(in+out) footprint is then ~8 MiB, well under the scoped
    VMEM limit on v5e/v6e/v7x. Keep >= 8 grid steps when the array is large
    enough (megacore sharding + DMA/compute overlap on v7x), but never shrink
    tiles below ~256 KiB to do so.
    """
    row_bytes = max(1, width * itemsize)
    tm = max(8, (2 * 1024 * 1024) // row_bytes)
    min_tile_rows = max(8, (256 * 1024) // row_bytes)
    min_steps = 8
    if rows // min_steps >= min_tile_rows:
        tm = min(tm, rows // min_steps)
    tm = max(8, (tm // 8) * 8)                # f32 sublane multiple
    if tm >= rows:
        return rows                           # single block == full array dim (always legal)
    return tm


def channel_attention(x, w1, w2):
    """x: (..., C); w1: (C//r, C) = fc1.weight; w2: (C, C//r) = fc2.weight (PyTorch layout)."""
    orig_shape = x.shape
    C = int(orig_shape[-1])
    H = int(w1.shape[0])
    M = 1
    for d in orig_shape[:-1]:
        M *= int(d)
    x2d = x.reshape(M, C)
    itemsize = x2d.dtype.itemsize

    # Lane packing factor: fold `pack` consecutive rows into one 128-lane row.
    if C < 128 and 128 % C == 0:
        pack = 128 // C
    else:
        pack = 1                               # already lane-dense (or awkward C)

    # Block-diagonal packed weights, built from w1.T / w2.T (so the kernel is a
    # plain x @ W with no transpose in the call path). Tiny one-time cost.
    eye = jnp.eye(pack, dtype=w1.dtype)
    w1p = jnp.kron(eye, w1.T)                  # (pack*C, pack*H)
    w2p = jnp.kron(eye, w2.T)                  # (pack*H, pack*C)

    # Pad M to a multiple of `pack`, then view the contiguous slab as lane-dense rows.
    rows_pad = pl.cdiv(M, pack) * pack
    if rows_pad != M:
        x2d = jnp.pad(x2d, ((0, rows_pad - M), (0, 0)))
    rows = rows_pad // pack
    width = pack * C
    xp = x2d.reshape(rows, width)

    tm = _pick_tm(rows, width, itemsize)
    grid = (pl.cdiv(rows, tm),)

    cost = pl.CostEstimate(
        flops=4 * M * C * H,                                   # two M x C x H matmuls
        transcendentals=M * C,                                 # sigmoid exp
        bytes_accessed=(2 * M * C + int(w1.size) + int(w2.size)) * itemsize,
    )

    outp = pl.pallas_call(
        _channel_attention_kernel,
        out_shape=jax.ShapeDtypeStruct((rows, width), x.dtype),
        grid_spec=pl.GridSpec(
            grid=grid,
            in_specs=[
                pl.BlockSpec((tm, width), lambda i: (i, 0)),   # lane-dense row tile of x
                pl.BlockSpec(w1p.shape, lambda i: (0, 0)),     # packed fc1 weight, VMEM-resident
                pl.BlockSpec(w2p.shape, lambda i: (0, 0)),     # packed fc2 weight, VMEM-resident
            ],
            out_specs=pl.BlockSpec((tm, width), lambda i: (i, 0)),
        ),
        compiler_params=pltpu.CompilerParams(
            dimension_semantics=("parallel",),                 # shard row tiles across TCs (v7x)
            vmem_limit_bytes=32 * 1024 * 1024,                 # load-bearing on v5e (16 MiB default)
        ),
        cost_estimate=cost,
    )(xp, w1p, w2p)

    out2d = outp.reshape(rows_pad, C)[:M]
    return out2d.reshape(orig_shape)


def reference(x, w1, w2):
    y = jnp.maximum(x @ w1.T, 0.0)
    y = jax.nn.sigmoid(y @ w2.T)
    return x * y


if __name__ == "__main__":
    num_channels = 32
    reduction = 4
    hidden = num_channels // reduction

    key = jax.random.PRNGKey(0)
    kx, k1, k2, kx2, kx3 = jax.random.split(key, 5)

    # Deterministic synthetic parameters (shapes match nn.Linear(..., bias=False)).
    w1 = jax.random.normal(k1, (hidden, num_channels), dtype=jnp.float32) * 0.1  # fc1.weight
    w2 = jax.random.normal(k2, (num_channels, hidden), dtype=jnp.float32) * 0.1  # fc2.weight

    # Case 1: small input (batch=2, seq=8, channels=32) -> single packed block.
    x_small = jax.random.normal(kx, (2, 8, num_channels), dtype=jnp.float32)
    out_small = jax.block_until_ready(channel_attention(x_small, w1, w2))
    ref_small = reference(x_small, w1, w2)
    assert out_small.shape == x_small.shape
    assert jnp.allclose(out_small, ref_small, atol=1e-5, rtol=1e-5), "mismatch (small) vs reference"

    # Case 2: larger input exercising the multi-block pipelined / megacore path.
    x_big = jax.random.normal(kx2, (4, 8192, num_channels), dtype=jnp.float32)
    out_big = jax.block_until_ready(channel_attention(x_big, w1, w2))
    ref_big = reference(x_big, w1, w2)
    assert out_big.shape == x_big.shape
    assert jnp.allclose(out_big, ref_big, atol=1e-5, rtol=1e-5), "mismatch (big) vs reference"

    # Case 3: row count not divisible by the packing factor -> exercises padding/trim path.
    x_rag = jax.random.normal(kx3, (3, 7, num_channels), dtype=jnp.float32)
    out_rag = jax.block_until_ready(channel_attention(x_rag, w1, w2))
    ref_rag = reference(x_rag, w1, w2)
    assert out_rag.shape == x_rag.shape
    assert jnp.allclose(out_rag, ref_rag, atol=1e-5, rtol=1e-5), "mismatch (ragged) vs reference"

    print("KERNEL_OK")
</pallas_src>

<mosaic_0001>
module attributes {stable_mosaic.version = 11 : i64} {
  func.func @_channel_attention_kernel(%arg0: i32, %arg1: memref<4x128xf32, #tpu.memory_space<vmem>>, %arg2: memref<128x32xf32, #tpu.memory_space<vmem>>, %arg3: memref<32x128xf32, #tpu.memory_space<vmem>>, %arg4: memref<4x128xf32, #tpu.memory_space<vmem>>) attributes {dimension_semantics = [#tpu.dimension_semantics<parallel>], iteration_bounds = array<i64: 1>, scalar_prefetch = 0 : i64, scratch_operands = 0 : i64, tpu.core_type = #tpu.core_type<tc>, window_params = [{transform_indices = @transform_0, window_bounds = array<i64: 4, 128>}, {pipeline_mode = #tpu.pipeline_mode<synchronous>, transform_indices = @transform_1, window_bounds = array<i64: 128, 32>}, {pipeline_mode = #tpu.pipeline_mode<synchronous>, transform_indices = @transform_2, window_bounds = array<i64: 32, 128>}, {transform_indices = @transform_3, window_bounds = array<i64: 4, 128>}]} {
    %c0 = arith.constant 0 : index
    %c0_0 = arith.constant 0 : index
    %0 = vector.load %arg1[%c0, %c0_0] : memref<4x128xf32, #tpu.memory_space<vmem>>, vector<4x128xf32>
    %c0_1 = arith.constant 0 : index
    %c0_2 = arith.constant 0 : index
    %1 = vector.load %arg2[%c0_1, %c0_2] : memref<128x32xf32, #tpu.memory_space<vmem>>, vector<128x32xf32>
    %cst = arith.constant dense<0.000000e+00> : vector<4x32xf32>
    %2 = tpu.matmul %0, %1, %cst {dimension_numbers = #tpu.dot_dimension_numbers<[1], [0], [0], [1], [0, 0, 1, 1], [], []>} : vector<4x128xf32>, vector<128x32xf32>, vector<4x32xf32> -> vector<4x32xf32>
    %cst_3 = arith.constant 0.000000e+00 : f32
    %3 = vector.broadcast %cst_3 : f32 to vector<4x32xf32>
    %4 = arith.maximumf %2, %3 : vector<4x32xf32>
    %c0_4 = arith.constant 0 : index
    %c0_5 = arith.constant 0 : index
    %5 = vector.load %arg3[%c0_4, %c0_5] : memref<32x128xf32, #tpu.memory_space<vmem>>, vector<32x128xf32>
    %cst_6 = arith.constant dense<0.000000e+00> : vector<4x128xf32>
    %6 = tpu.matmul %4, %5, %cst_6 {dimension_numbers = #tpu.dot_dimension_numbers<[1], [0], [0], [1], [0, 0, 1, 1], [], []>} : vector<4x32xf32>, vector<32x128xf32>, vector<4x128xf32> -> vector<4x128xf32>
    %7 = arith.negf %6 : vector<4x128xf32>
    %8 = math.exp %7 : vector<4x128xf32>
    %cst_7 = arith.constant 1.000000e+00 : f32
    %9 = vector.broadcast %cst_7 : f32 to vector<4x128xf32>
    %10 = arith.addf %9, %8 : vector<4x128xf32>
    %11 = arith.divf %9, %10 : vector<4x128xf32>
    %12 = arith.mulf %0, %11 : vector<4x128xf32>
    %c0_8 = arith.constant 0 : index
    %c0_9 = arith.constant 0 : index
    %13 = vector.load %arg4[%c0_8, %c0_9] : memref<4x128xf32, #tpu.memory_space<vmem>>, vector<4x128xf32>
    tpu.vector_store %arg4[%c0_8, %c0_9], %12 {strides = array<i32>} : memref<4x128xf32, #tpu.memory_space<vmem>>, vector<4x128xf32>,
    return
  }
  func.func @transform_0(%arg0: i32) -> (i32, i32) {
    %c0_i32 = arith.constant 0 : i32
    %c0_i32_0 = arith.constant 0 : i32
    return %arg0, %c0_i32 : i32, i32
  }
  func.func @transform_1(%arg0: i32) -> (i32, i32) {
    %c0_i32 = arith.constant 0 : i32
    %c0_i32_0 = arith.constant 0 : i32
    %c0_i32_1 = arith.constant 0 : i32
    return %c0_i32, %c0_i32_0 : i32, i32
  }
  func.func @transform_2(%arg0: i32) -> (i32, i32) {
    %c0_i32 = arith.constant 0 : i32
    %c0_i32_0 = arith.constant 0 : i32
    %c0_i32_1 = arith.constant 0 : i32
    return %c0_i32, %c0_i32_0 : i32, i32
  }
  func.func @transform_3(%arg0: i32) -> (i32, i32) {
    %c0_i32 = arith.constant 0 : i32
    %c0_i32_0 = arith.constant 0 : i32
    return %arg0, %c0_i32 : i32, i32
  }
}

</mosaic_0001>

<bundles_post_ra>
// kernel: tpu_custom_call.1
= control target key start
LH: loop header
LB: loop body
LE: loop exit
PB: predicated region body
PF: predicated region fallthrough
CT: control target
= control target key end

     0   :  { %v335_v3 = vmov 0.0|0.0   ;;  %vm336_vm0 = vmmov 0   ;;  %v337_v6 = vmov 0.0   ;;  %s434_s0 = inlined_call_operand.vmem [shape: f32[4,128], index: 0, kind: input, shape index: {}]   ;;  %s435_s1 = inlined_call_operand.vmem [shape: f32[128,32], index: 1, kind: input, shape index: {}]   ;;  %s436_s2 = inlined_call_operand.vmem [shape: f32[32,128], index: 2, kind: input, shape index: {}]   ;;  %s437_s3 = inlined_call_operand.hbm [shape: f32[4,128], index: 3, kind: output, shape index: {}]  }
   0x1   :  { %v16_v0 = vld [vmem:[%s435_s1] sm:$0xff]  ;;  %v17_v1 = vld [vmem:[%s435_s1 + $0x8] sm:$0xff]  ;;  %v18_v2 = vld [vmem:[%s435_s1 + $0x10] sm:$0xff]  ;;  %273 = vmatprep.subr.bf16.mxu0 %v335_v3  ;;  %259 = vmatprep.mubr.msk.f32.mxu0 %vm336_vm0, %v337_v6 }
   0x2   :  { %v274_v4 = vpack.c.bf16 %v17_v1, %v16_v0  ;;  %v19_v5 = vld [vmem:[%s435_s1 + $0x18] sm:$0xff]  ;;  %297 = vmatprep.subr.bf16.mxu1 %v335_v3  ;;  %270 = vmatprep.mubr.msk.f32.mxu1 %vm336_vm0, %v337_v6  ;;  %v20_v8 = vld [vmem:[%s435_s1 + $0x20] sm:$0xff]  ;;  %v21_v9 = vld [vmem:[%s435_s1 + $0x28] sm:$0xff] }
   0x3   :  { %v277_v7 = vpack.c.bf16 %v19_v5, %v18_v2  ;;  %v103_v10 = vld [vmem:[%s436_s2] sm:$0xff]  ;;  %v104_v11 = vld [vmem:[%s436_s2 + $0x8] sm:$0xff] }
   0x4   :  { %275 = vmatpush3.bf16.msra.mxu0 %v274_v4 }
   0x5   :  { %276 = vmatprep.subr.bf16.mxu0 %v335_v3 }
   0x6   :  { %8 = vsyncpa [#allocation3], 0  ;;  %v280_v12 = vpack.c.bf16 %v21_v9, %v20_v8  ;;  %v298_v13 = vpack.c.bf16 %v104_v11, %v103_v10  ;;  %v22_v14 = vld [vmem:[%s435_s1 + $0x30] sm:$0xff]  ;;  %v23_v15 = vld [vmem:[%s435_s1 + $0x38] sm:$0xff]  ;;  %vm107_vm1 = vcmask 261120  }
   0x7   :  { %v283_v16 = vpack.c.bf16 %v23_v15, %v22_v14  ;;  %v24_v17 = vld [vmem:[%s435_s1 + $0x40] sm:$0xff]  ;;  %v25_v18 = vld [vmem:[%s435_s1 + $0x48] sm:$0xff]  ;;  %v26_v20 = vld [vmem:[%s435_s1 + $0x50] sm:$0xff] }
   0x8   :  { %278 = vmatpush3.bf16.msra.mxu0 %v277_v7  ;;  %299 = vmatpush3.bf16.msra.mxu1 %v298_v13  ;;  %v286_v19 = vpack.c.bf16 %v25_v18, %v24_v17  ;;  %v27_v21 = vld [vmem:[%s435_s1 + $0x58] sm:$0xff]  ;;  %v28_v23 = vld [vmem:[%s435_s1 + $0x60] sm:$0xff]  ;;  %v29_v24 = vld [vmem:[%s435_s1 + $0x68] sm:$0xff] }
   0x9   :  { %279 = vmatprep.subr.bf16.mxu0 %v335_v3  ;;  %300 = vmatprep.subr.bf16.mxu1 %v335_v3  ;;  %v289_v22 = vpack.c.bf16 %v27_v21, %v26_v20  ;;  %v292_v25 = vpack.c.bf16 %v29_v24, %v28_v23  ;;  %v30_v26 = vld [vmem:[%s435_s1 + $0x70] sm:$0xff]  ;;  %v31_v27 = vld [vmem:[%s435_s1 + $0x78] sm:$0xff]  ;;  %v15_v29 = vld [vmem:[%s434_s0] sm:$0xf]  ;;  %s338_s0 = smov [#allocation2]  }
   0xa   :  { %v295_v28 = vpack.c.bf16 %v31_v27, %v30_v26  ;;  %v105_v30 = vld [vmem:[%s436_s2 + $0x10] sm:$0xff]  ;;  %v106_v31 = vld [vmem:[%s436_s2 + $0x18] sm:$0xff]  ;;  %s195_s1 = sshll.u32 %s338_s0, 4  ;;  %s196_s1 = int_to_ptr.vmem [resolvable:$true] %s195_s1 }
   0xb   :  { %v301_v32 = vpack.c.bf16 %v106_v31, %v105_v30  ;;  %s311_s2 = scalar_lea.vmem %s196_s1, 64  ;;  %p316_p1 = scmp.lt.s32.totalorder %s196_s1, %s196_s1 }
   0xc   :  { %281 = vmatpush3.bf16.msra.mxu0 %v280_v12  ;;  %p312_p0 = scmp.ne.s32.totalorder %s196_s1, %s311_s2  ;;  %p317_p2 = scmp.lt.s32.totalorder %s311_s2, %s311_s2 }
   0xd   :  { %282 = vmatprep.subr.bf16.mxu0 %v335_v3  ;;  %302 = vmatpush3.bf16.msra.mxu1 %v301_v32 }
   0xe   :  { %p318_p3 = por %p317_p2, %p316_p1 }
  0x10   :  { %284 = vmatpush3.bf16.msra.mxu0 %v283_v16  ;;  %p319_p4 = pnand %p318_p3, %p312_p0 }
  0x11   :  { %285 = vmatprep.subr.bf16.mxu0 %v335_v3 }
  0x14   :  { %287 = vmatpush3.bf16.msra.mxu0 %v286_v19 }
  0x15   :  { %288 = vmatprep.subr.bf16.mxu0 %v335_v3 }
  0x18   :  { %290 = vmatpush3.bf16.msra.mxu0 %v289_v22 }
  0x19   :  { %291 = vmatprep.subr.bf16.mxu0 %v335_v3 }
  0x1c   :  { %293 = vmatpush3.bf16.msra.mxu0 %v292_v25 }
  0x1d   :  { %294 = vmatprep.subr.bf16.mxu0 %v335_v3 }
  0x20   :  { %296 = vmatpush3.bf16.msra.mxu0 %v295_v28 }
  0x23   :  { %260 = vmatmul.mubr.f32.vlgmr.msra.gmra.mrb[0].mxu0 %v15_v29 }
  0xf6   :  { %v98_v33 = vpop.f32.mrb[0].mxu0 }
  0xf7   :  { %v102_v34 = vmax.f32 %v98_v33, 0.0  ;;  %v261_v35 = vpop.f32.mrb[1].mxu0 }
  0xf9   :  { %271 = vmatmul.mubr.msk.f32.vlgmr.msra.gmra.mrb[0].mxu1 %vm107_vm1, %v102_v34 }
 0x1cc   :  { %v177_v36 = vpop.f32.mrb[0].mxu1 }
 0x1cd   :  { %v204_v37 = vmul.f32 -1.442695, %v177_v36  ;;  %v272_v38 = vpop.f32.mrb[1].mxu1 }
 0x1cf   :  { %307 = vpow2.f32 %v204_v37 }
 0x1d9   :  { %v308_v39 = vpop.eup %307 }
 0x1da   :  { %v184_v40 = vadd.f32 1.0, %v308_v39 }
 0x1dc   :  { %309 = vrcp.f32 %v184_v40 }
 0x1e6   :  { %v310_v41 = vpop.eup %309 }
 0x1e7   :  { %v187_v42 = vmul.f32 %v310_v41, %v15_v29 }
 0x1e9   :  { %188 = vst [vmem:[#allocation2] sm:$0xf] %v187_v42 }
 0x1ea   :  { %322 = shalt.err (!%p319_p4)
}
 0x1eb   :  { %s323_s29 = scalar_lea.hbm %s437_s3, 64 }
 0x1ec   :  { %p324_p5 = scmp.ne.s32.totalorder %s437_s3, %s323_s29  ;;  %p327_p6 = scmp.lt.u32.totalorder %s323_s29, %s437_s3 }
 0x1ee   :  { %p329_p7 = pnand %p327_p6, %p324_p5 }
 0x1f0   :  { %332 = shalt.err (!%p329_p7)
}
 0x1f1   :  { %198 = dma.vmem_to_hbm [thread:$0]  %s196_s1, 64, %s437_s3, [#allocation3]  }
 0x1f2   :  { %333 = dma.done.wait [#allocation3], 64  }
 0x1f3   :  { %334 = vsyncadd [#allocation3], 4294967232 }
 0x1f4   :  { %202 = vsyncpa [#allocation3], 1 }

</bundles_post_ra>
